<compile_context>
chip_gen: v6e
topology: v6e:2x2x1
jax: 0.10.0
libtpu: 0.0.40
codegen_flags: <defaults>
</compile_context>

<pallas_src>
import jax
import jax.numpy as jnp
from jax.experimental import pallas as pl
from jax.experimental.pallas import tpu as pltpu


def _round_up(x, m):
    return (x + m - 1) // m * m


# ----------------------------------------------------------------------------
# Kernel
# ----------------------------------------------------------------------------
def make_vae_kernel(latent, h0, n_rest):
    """Build the fused VAE forward kernel.

    latent : latent dimension L (for slicing the fused mu|logvar head)
    h0     : first classifier hidden width (for slicing the fused z-matmul)
    n_rest : number of classifier Linear layers after the fused layer 0
    """
    n_params = 8 + 2 * n_rest  # w1,b1, wml,bml, wz0,bz0, cls..., w4p,b4p

    def kernel(x_ref, eps_ref, *refs):
        p = refs[:n_params]
        out_ref = refs[n_params]

        f32, bf16 = jnp.float32, jnp.bfloat16

        w1, b1 = p[0][...], p[1][...]
        wml, bml = p[2][...], p[3][...]
        wz0, bz0 = p[4][...], p[5][...]
        cls = p[6:6 + 2 * n_rest]
        w4, b4 = p[6 + 2 * n_rest][...], p[7 + 2 * n_rest][...]

        # ---- encoder -------------------------------------------------------
        x = x_ref[...]                                       # bf16 stream
        h = jnp.maximum(
            jnp.dot(x, w1, preferred_element_type=f32) + b1, 0.0).astype(bf16)

        # fused mu|logvar head: one MXU pass, result reused directly for store
        hml = jnp.dot(h, wml, preferred_element_type=f32) + bml   # (TB, 2L) f32
        mu = hml[:, :latent]
        lv = hml[:, latent:]

        # reparameterise: eps ~ Uniform[0,1) (matches torch.rand_like)
        eps = eps_ref[...]
        z = (eps * jnp.exp(0.5 * lv) + mu).astype(bf16)

        # ---- fused decoder-fc3 + classifier-layer-0 (both consume z) --------
        # decoder block is first so the 256-wide slice is lane-0 aligned.
        t = jnp.maximum(
            jnp.dot(z, wz0, preferred_element_type=f32) + bz0, 0.0).astype(bf16)
        d = t[:, :256]              # decoder hidden activation (aligned view)
        a = t[:, 256:256 + h0]      # classifier hidden-0 activation

        # ---- remaining classifier layers ------------------------------------
        y = None
        for li in range(n_rest):
            w = cls[2 * li][...]
            b = cls[2 * li + 1][...]
            pre = jnp.dot(a, w, preferred_element_type=f32) + b
            if li < n_rest - 1:
                a = jnp.maximum(pre, 0.0).astype(bf16)   # ReLU on hidden layers
            else:
                y = jax.nn.sigmoid(pre)                  # sigmoid on output layer

        # ---- decoder output (fc4 pre-padded to slab tail width) -------------
        xr = jax.nn.sigmoid(jnp.dot(d, w4, preferred_element_type=f32) + b4)

        # ---- single lane-dense store: [mu | logvar | Y | X_recon | pad] -----
        out_ref[...] = jnp.concatenate([hml, y, xr], axis=-1)

    return kernel


# ----------------------------------------------------------------------------
# Parameter construction / fusion
# ----------------------------------------------------------------------------
def init_params(key, input_shape, latent_shape, hidden_layers, output_shape):
    """Deterministic raw parameter init. Weights (in, out); biases (1, out). f32."""
    def linear(k, fan_in, fan_out):
        kw, kb = jax.random.split(k)
        lim = 1.0 / jnp.sqrt(jnp.float32(fan_in))
        w = jax.random.uniform(kw, (fan_in, fan_out), jnp.float32, -lim, lim)
        b = jax.random.uniform(kb, (1, fan_out), jnp.float32, -lim, lim)
        return w, b

    n_cls = len(hidden_layers) + 1
    keys = jax.random.split(key, 3 + n_cls + 2)
    params = []
    # encoder
    params += list(linear(keys[0], input_shape, 256))          # fc1
    params += list(linear(keys[1], 256, latent_shape))         # fc2_mu
    params += list(linear(keys[2], 256, latent_shape))         # fc2_logvar
    # classifier (fixed deterministic weights; see TODO(synk) above)
    dims = [latent_shape] + list(hidden_layers) + [output_shape]
    for i in range(n_cls):
        params += list(linear(keys[3 + i], dims[i], dims[i + 1]))
    # decoder
    params += list(linear(keys[3 + n_cls], latent_shape, 256))     # fc3
    params += list(linear(keys[4 + n_cls], 256, input_shape))      # fc4
    return params


def prepare_params(params, input_shape, latent_shape, hidden_layers, output_shape):
    """Fuse mu|logvar and fc3|cls0 weights; pre-pad fc4 to the output slab tail.

    Weights -> bf16, biases stay f32.
    """
    bf16 = jnp.bfloat16
    L, O = latent_shape, output_shape
    n_cls = len(hidden_layers) + 1
    w1, b1, wmu, bmu, wlv, blv = params[:6]
    cls = params[6:6 + 2 * n_cls]
    w3, b3, w4, b4 = params[6 + 2 * n_cls:]

    pack_w = _round_up(2 * L + O + input_shape, 128)
    xr_tail_w = pack_w - 2 * L - O

    wml = jnp.concatenate([wmu, wlv], axis=1)          # (256, 2L)
    bml = jnp.concatenate([bmu, blv], axis=1)          # (1, 2L)
    # decoder fc3 FIRST so its 256-wide activation block is lane-0 aligned.
    wz0 = jnp.concatenate([w3, cls[0]], axis=1)        # (L, 256 + H0)
    bz0 = jnp.concatenate([b3, cls[1]], axis=1)        # (1, 256 + H0)

    # Pre-pad fc4 to the slab tail width: zero weight columns, large-negative
    # bias so pad lanes land at sigmoid(-30) ~ 0 (wrapper slices them off).
    pad = xr_tail_w - input_shape
    w4p = jnp.pad(w4, ((0, 0), (0, pad)))
    b4p = jnp.pad(b4, ((0, 0), (0, pad)), constant_values=-30.0)

    out = [w1.astype(bf16), b1, wml.astype(bf16), bml, wz0.astype(bf16), bz0]
    for i in range(1, n_cls):
        out += [cls[2 * i].astype(bf16), cls[2 * i + 1]]
    out += [w4p.astype(bf16), b4p]
    return out


# ----------------------------------------------------------------------------
# Wrapper
# ----------------------------------------------------------------------------
def vae_forward(x, eps, prepared, *, input_shape, latent_shape, hidden_layers,
                output_shape, batch_tile=2048):
    """Returns (X_recon, mu, logvar, Y).

    batch_tile: max batch rows per grid step.  2048 with bf16 x is safe on all
    generations (incl. v7x's 64 MiB VMEM); larger tiles buy little since per-
    step overhead is already amortized at 1-2K rows.
    """
    assert len(hidden_layers) >= 1
    B = x.shape[0]
    L, O = latent_shape, output_shape
    h0 = hidden_layers[0]
    n_rest = len(hidden_layers)   # classifier layers after the fused layer 0

    pack_w = _round_up(2 * L + O + input_shape, 128)

    # Batch tiling: >= 2 grid steps whenever the batch allows it so
    # dimension_semantics=("parallel",) can shard across v7x's 2 TensorCores;
    # TB derived by ceil-division so awkward batch sizes don't ~double padding.
    padded8 = _round_up(B, 8)
    min_steps = 2 if padded8 >= 16 else 1
    n_steps = max(min_steps, pl.cdiv(padded8, batch_tile))
    TB = _round_up(pl.cdiv(padded8, n_steps), 8)
    padded_B = _round_up(B, TB)

    # Stream x as bf16 (dominant HBM read); eps stays f32 (narrow).
    x = x.astype(jnp.bfloat16)
    if padded_B != B:
        x = jnp.pad(x, ((0, padded_B - B), (0, 0)))
        eps = jnp.pad(eps, ((0, padded_B - B), (0, 0)))

    kernel = make_vae_kernel(L, h0, n_rest)
    grid = (padded_B // TB,)

    # tiled specs for per-row data
    x_spec = pl.BlockSpec((TB, input_shape), lambda i: (i, 0))
    eps_spec = pl.BlockSpec((TB, L), lambda i: (i, 0))
    # weights/biases: full blocks, constant index_map -> stay VMEM-resident
    param_specs = [pl.BlockSpec(tuple(p.shape), lambda i: (0, 0)) for p in prepared]

    out_shape = jax.ShapeDtypeStruct((padded_B, pack_w), jnp.float32)
    out_spec = pl.BlockSpec((TB, pack_w), lambda i: (i, 0))

    # Explicit scoped-VMEM budget (defaults: 16 MiB v5e / 32 MiB v6e+); cap at
    # 64 MiB so we never exceed v7x physical VMEM.
    param_bytes = sum(int(p.size) * p.dtype.itemsize for p in prepared)
    stream_bytes = 2 * TB * (2 * input_shape + 4 * L + 4 * pack_w)  # dbl-buffered
    act_bytes = 8 * TB * (256 + 2 * L + 256 + h0 + pack_w)          # headroom
    vmem_limit = int(min(max(param_bytes + stream_bytes + act_bytes + (4 << 20),
                             32 << 20), 64 << 20))

    fn = pl.pallas_call(
        kernel,
        out_shape=out_shape,
        grid=grid,
        in_specs=[x_spec, eps_spec] + param_specs,
        out_specs=out_spec,
        compiler_params=pltpu.CompilerParams(
            dimension_semantics=("parallel",),
            vmem_limit_bytes=vmem_limit),
    )
    packed = fn(x, eps, *prepared)

    mu = packed[:B, :L]
    logvar = packed[:B, L:2 * L]
    y = packed[:B, 2 * L:2 * L + O]
    x_recon = packed[:B, 2 * L + O:2 * L + O + input_shape]
    return x_recon, mu, logvar, y


# ----------------------------------------------------------------------------
# Pure-JAX reference (raw, unfused f32 params) for correctness checking
# ----------------------------------------------------------------------------
def vae_reference(x, eps, params, hidden_layers):
    n_cls = len(hidden_layers) + 1
    w1, b1, wmu, bmu, wlv, blv = params[:6]
    cls = params[6:6 + 2 * n_cls]
    w3, b3, w4, b4 = params[6 + 2 * n_cls:]
    h = jnp.maximum(x @ w1 + b1, 0.0)
    mu = h @ wmu + bmu
    lv = h @ wlv + blv
    z = eps * jnp.exp(0.5 * lv) + mu
    a = z
    for i in range(n_cls):
        a = a @ cls[2 * i] + cls[2 * i + 1]
        a = jnp.maximum(a, 0.0) if i < n_cls - 1 else jax.nn.sigmoid(a)
    d = jnp.maximum(z @ w3 + b3, 0.0)
    xr = jax.nn.sigmoid(d @ w4 + b4)
    return xr, mu, lv, a


if __name__ == "__main__":
    # Small, forward-consistent shapes.
    BATCH = 8
    INPUT_SHAPE = 64
    LATENT_SHAPE = 16
    HIDDEN_LAYERS = (32, 32)
    OUTPUT_SHAPE = 8

    key = jax.random.PRNGKey(0)
    kx, kp, ke = jax.random.split(key, 3)
    x = jax.random.normal(kx, (BATCH, INPUT_SHAPE), jnp.float32)
    # eps ~ Uniform[0,1) matches torch.rand_like in the PyTorch encoder.
    eps = jax.random.uniform(ke, (BATCH, LATENT_SHAPE), jnp.float32)

    raw_params = init_params(kp, INPUT_SHAPE, LATENT_SHAPE, HIDDEN_LAYERS,
                             OUTPUT_SHAPE)
    prepared = prepare_params(raw_params, INPUT_SHAPE, LATENT_SHAPE,
                              HIDDEN_LAYERS, OUTPUT_SHAPE)

    x_recon, mu, logvar, y = vae_forward(
        x, eps, prepared,
        input_shape=INPUT_SHAPE, latent_shape=LATENT_SHAPE,
        hidden_layers=HIDDEN_LAYERS, output_shape=OUTPUT_SHAPE)
    jax.block_until_ready((x_recon, mu, logvar, y))

    # Correctness check against unfused f32 reference (bf16 weights/x => loose tol).
    xr_ref, mu_ref, lv_ref, y_ref = vae_reference(x, eps, raw_params,
                                                  HIDDEN_LAYERS)
    assert x_recon.shape == (BATCH, INPUT_SHAPE)
    assert mu.shape == (BATCH, LATENT_SHAPE)
    assert logvar.shape == (BATCH, LATENT_SHAPE)
    assert y.shape == (BATCH, OUTPUT_SHAPE)
    assert jnp.allclose(mu, mu_ref, atol=5e-2, rtol=5e-2)
    assert jnp.allclose(logvar, lv_ref, atol=5e-2, rtol=5e-2)
    assert jnp.allclose(x_recon, xr_ref, atol=5e-2, rtol=5e-2)
    assert jnp.allclose(y, y_ref, atol=5e-2, rtol=5e-2)
    assert bool(jnp.all((x_recon >= 0.0) & (x_recon <= 1.0)))
    assert bool(jnp.all((y >= 0.0) & (y <= 1.0)))

    print("KERNEL_OK")
</pallas_src>

<mosaic_0001>
module attributes {stable_mosaic.version = 11 : i64} {
  func.func @kernel(%arg0: i32, %arg1: memref<8x64xbf16, #tpu.memory_space<vmem>>, %arg2: memref<8x16xf32, #tpu.memory_space<vmem>>, %arg3: memref<64x256xbf16, #tpu.memory_space<vmem>>, %arg4: memref<1x256xf32, #tpu.memory_space<vmem>>, %arg5: memref<256x32xbf16, #tpu.memory_space<vmem>>, %arg6: memref<1x32xf32, #tpu.memory_space<vmem>>, %arg7: memref<16x288xbf16, #tpu.memory_space<vmem>>, %arg8: memref<1x288xf32, #tpu.memory_space<vmem>>, %arg9: memref<32x32xbf16, #tpu.memory_space<vmem>>, %arg10: memref<1x32xf32, #tpu.memory_space<vmem>>, %arg11: memref<32x8xbf16, #tpu.memory_space<vmem>>, %arg12: memref<1x8xf32, #tpu.memory_space<vmem>>, %arg13: memref<256x88xbf16, #tpu.memory_space<vmem>>, %arg14: memref<1x88xf32, #tpu.memory_space<vmem>>, %arg15: memref<8x128xf32, #tpu.memory_space<vmem>>) attributes {dimension_semantics = [#tpu.dimension_semantics<parallel>], iteration_bounds = array<i64: 1>, scalar_prefetch = 0 : i64, scratch_operands = 0 : i64, tpu.core_type = #tpu.core_type<tc>, window_params = [{transform_indices = @transform_0, window_bounds = array<i64: 8, 64>}, {transform_indices = @transform_1, window_bounds = array<i64: 8, 16>}, {pipeline_mode = #tpu.pipeline_mode<synchronous>, transform_indices = @transform_2, window_bounds = array<i64: 64, 256>}, {pipeline_mode = #tpu.pipeline_mode<synchronous>, transform_indices = @transform_3, window_bounds = array<i64: 1, 256>}, {pipeline_mode = #tpu.pipeline_mode<synchronous>, transform_indices = @transform_4, window_bounds = array<i64: 256, 32>}, {pipeline_mode = #tpu.pipeline_mode<synchronous>, transform_indices = @transform_5, window_bounds = array<i64: 1, 32>}, {pipeline_mode = #tpu.pipeline_mode<synchronous>, transform_indices = @transform_6, window_bounds = array<i64: 16, 288>}, {pipeline_mode = #tpu.pipeline_mode<synchronous>, transform_indices = @transform_7, window_bounds = array<i64: 1, 288>}, {pipeline_mode = #tpu.pipeline_mode<synchronous>, transform_indices = @transform_8, window_bounds = array<i64: 32, 32>}, {pipeline_mode = #tpu.pipeline_mode<synchronous>, transform_indices = @transform_9, window_bounds = array<i64: 1, 32>}, {pipeline_mode = #tpu.pipeline_mode<synchronous>, transform_indices = @transform_10, window_bounds = array<i64: 32, 8>}, {pipeline_mode = #tpu.pipeline_mode<synchronous>, transform_indices = @transform_11, window_bounds = array<i64: 1, 8>}, {pipeline_mode = #tpu.pipeline_mode<synchronous>, transform_indices = @transform_12, window_bounds = array<i64: 256, 88>}, {pipeline_mode = #tpu.pipeline_mode<synchronous>, transform_indices = @transform_13, window_bounds = array<i64: 1, 88>}, {transform_indices = @transform_14, window_bounds = array<i64: 8, 128>}]} {
    %c0 = arith.constant 0 : index
    %c0_0 = arith.constant 0 : index
    %0 = vector.load %arg3[%c0, %c0_0] : memref<64x256xbf16, #tpu.memory_space<vmem>>, vector<64x256xbf16>
    %c0_1 = arith.constant 0 : index
    %c0_2 = arith.constant 0 : index
    %1 = vector.load %arg4[%c0_1, %c0_2] : memref<1x256xf32, #tpu.memory_space<vmem>>, vector<1x256xf32>
    %c0_3 = arith.constant 0 : index
    %c0_4 = arith.constant 0 : index
    %2 = vector.load %arg5[%c0_3, %c0_4] : memref<256x32xbf16, #tpu.memory_space<vmem>>, vector<256x32xbf16>
    %c0_5 = arith.constant 0 : index
    %c0_6 = arith.constant 0 : index
    %3 = vector.load %arg6[%c0_5, %c0_6] : memref<1x32xf32, #tpu.memory_space<vmem>>, vector<1x32xf32>
    %c0_7 = arith.constant 0 : index
    %c0_8 = arith.constant 0 : index
    %4 = vector.load %arg7[%c0_7, %c0_8] : memref<16x288xbf16, #tpu.memory_space<vmem>>, vector<16x288xbf16>
    %c0_9 = arith.constant 0 : index
    %c0_10 = arith.constant 0 : index
    %5 = vector.load %arg8[%c0_9, %c0_10] : memref<1x288xf32, #tpu.memory_space<vmem>>, vector<1x288xf32>
    %c0_11 = arith.constant 0 : index
    %c0_12 = arith.constant 0 : index
    %6 = vector.load %arg13[%c0_11, %c0_12] : memref<256x88xbf16, #tpu.memory_space<vmem>>, vector<256x88xbf16>
    %c0_13 = arith.constant 0 : index
    %c0_14 = arith.constant 0 : index
    %7 = vector.load %arg14[%c0_13, %c0_14] : memref<1x88xf32, #tpu.memory_space<vmem>>, vector<1x88xf32>
    %c0_15 = arith.constant 0 : index
    %c0_16 = arith.constant 0 : index
    %8 = vector.load %arg1[%c0_15, %c0_16] : memref<8x64xbf16, #tpu.memory_space<vmem>>, vector<8x64xbf16>
    %cst = arith.constant dense<0.000000e+00> : vector<8x256xf32>
    %9 = tpu.matmul %8, %0, %cst {dimension_numbers = #tpu.dot_dimension_numbers<[1], [0], [0], [1], [0, 0, 1, 1], [], []>} : vector<8x64xbf16>, vector<64x256xbf16>, vector<8x256xf32> -> vector<8x256xf32>
    %10 = vector.broadcast %1 : vector<1x256xf32> to vector<8x256xf32>
    %11 = arith.addf %9, %10 : vector<8x256xf32>
    %cst_17 = arith.constant 0.000000e+00 : f32
    %12 = vector.broadcast %cst_17 : f32 to vector<8x256xf32>
    %13 = arith.maximumf %11, %12 : vector<8x256xf32>
    %14 = arith.truncf %13 : vector<8x256xf32> to vector<8x256xbf16>
    %cst_18 = arith.constant dense<0.000000e+00> : vector<8x32xf32>
    %15 = tpu.matmul %14, %2, %cst_18 {dimension_numbers = #tpu.dot_dimension_numbers<[1], [0], [0], [1], [0, 0, 1, 1], [], []>} : vector<8x256xbf16>, vector<256x32xbf16>, vector<8x32xf32> -> vector<8x32xf32>
    %16 = vector.broadcast %3 : vector<1x32xf32> to vector<8x32xf32>
    %17 = arith.addf %15, %16 : vector<8x32xf32>
    %18 = vector.extract_strided_slice %17 {offsets = [0, 0], sizes = [8, 16], strides = [1, 1]} : vector<8x32xf32> to vector<8x16xf32>
    %19 = vector.extract_strided_slice %17 {offsets = [0, 16], sizes = [8, 16], strides = [1, 1]} : vector<8x32xf32> to vector<8x16xf32>
    %c0_19 = arith.constant 0 : index
    %c0_20 = arith.constant 0 : index
    %20 = vector.load %arg2[%c0_19, %c0_20] : memref<8x16xf32, #tpu.memory_space<vmem>>, vector<8x16xf32>
    %cst_21 = arith.constant 5.000000e-01 : f32
    %21 = vector.broadcast %cst_21 : f32 to vector<8x16xf32>
    %22 = arith.mulf %21, %19 : vector<8x16xf32>
    %23 = math.exp %22 : vector<8x16xf32>
    %24 = arith.mulf %20, %23 : vector<8x16xf32>
    %25 = arith.addf %24, %18 : vector<8x16xf32>
    %26 = arith.truncf %25 : vector<8x16xf32> to vector<8x16xbf16>
    %cst_22 = arith.constant dense<0.000000e+00> : vector<8x288xf32>
    %27 = tpu.matmul %26, %4, %cst_22 {dimension_numbers = #tpu.dot_dimension_numbers<[1], [0], [0], [1], [0, 0, 1, 1], [], []>} : vector<8x16xbf16>, vector<16x288xbf16>, vector<8x288xf32> -> vector<8x288xf32>
    %28 = vector.broadcast %5 : vector<1x288xf32> to vector<8x288xf32>
    %29 = arith.addf %27, %28 : vector<8x288xf32>
    %cst_23 = arith.constant 0.000000e+00 : f32
    %30 = vector.broadcast %cst_23 : f32 to vector<8x288xf32>
    %31 = arith.maximumf %29, %30 : vector<8x288xf32>
    %32 = arith.truncf %31 : vector<8x288xf32> to vector<8x288xbf16>
    %33 = vector.extract_strided_slice %32 {offsets = [0, 0], sizes = [8, 256], strides = [1, 1]} : vector<8x288xbf16> to vector<8x256xbf16>
    %34 = vector.extract_strided_slice %32 {offsets = [0, 256], sizes = [8, 32], strides = [1, 1]} : vector<8x288xbf16> to vector<8x32xbf16>
    %c0_24 = arith.constant 0 : index
    %c0_25 = arith.constant 0 : index
    %35 = vector.load %arg9[%c0_24, %c0_25] : memref<32x32xbf16, #tpu.memory_space<vmem>>, vector<32x32xbf16>
    %c0_26 = arith.constant 0 : index
    %c0_27 = arith.constant 0 : index
    %36 = vector.load %arg10[%c0_26, %c0_27] : memref<1x32xf32, #tpu.memory_space<vmem>>, vector<1x32xf32>
    %cst_28 = arith.constant dense<0.000000e+00> : vector<8x32xf32>
    %37 = tpu.matmul %34, %35, %cst_28 {dimension_numbers = #tpu.dot_dimension_numbers<[1], [0], [0], [1], [0, 0, 1, 1], [], []>} : vector<8x32xbf16>, vector<32x32xbf16>, vector<8x32xf32> -> vector<8x32xf32>
    %38 = vector.broadcast %36 : vector<1x32xf32> to vector<8x32xf32>
    %39 = arith.addf %37, %38 : vector<8x32xf32>
    %cst_29 = arith.constant 0.000000e+00 : f32
    %40 = vector.broadcast %cst_29 : f32 to vector<8x32xf32>
    %41 = arith.maximumf %39, %40 : vector<8x32xf32>
    %42 = arith.truncf %41 : vector<8x32xf32> to vector<8x32xbf16>
    %c0_30 = arith.constant 0 : index
    %c0_31 = arith.constant 0 : index
    %43 = vector.load %arg11[%c0_30, %c0_31] : memref<32x8xbf16, #tpu.memory_space<vmem>>, vector<32x8xbf16>
    %c0_32 = arith.constant 0 : index
    %c0_33 = arith.constant 0 : index
    %44 = vector.load %arg12[%c0_32, %c0_33] : memref<1x8xf32, #tpu.memory_space<vmem>>, vector<1x8xf32>
    %cst_34 = arith.constant dense<0.000000e+00> : vector<8x8xf32>
    %45 = tpu.matmul %42, %43, %cst_34 {dimension_numbers = #tpu.dot_dimension_numbers<[1], [0], [0], [1], [0, 0, 1, 1], [], []>} : vector<8x32xbf16>, vector<32x8xbf16>, vector<8x8xf32> -> vector<8x8xf32>
    %46 = vector.broadcast %44 : vector<1x8xf32> to vector<8x8xf32>
    %47 = arith.addf %45, %46 : vector<8x8xf32>
    %48 = arith.negf %47 : vector<8x8xf32>
    %49 = math.exp %48 : vector<8x8xf32>
    %cst_35 = arith.constant 1.000000e+00 : f32
    %50 = vector.broadcast %cst_35 : f32 to vector<8x8xf32>
    %51 = arith.addf %50, %49 : vector<8x8xf32>
    %52 = arith.divf %50, %51 : vector<8x8xf32>
    %cst_36 = arith.constant dense<0.000000e+00> : vector<8x88xf32>
    %53 = tpu.matmul %33, %6, %cst_36 {dimension_numbers = #tpu.dot_dimension_numbers<[1], [0], [0], [1], [0, 0, 1, 1], [], []>} : vector<8x256xbf16>, vector<256x88xbf16>, vector<8x88xf32> -> vector<8x88xf32>
    %54 = vector.broadcast %7 : vector<1x88xf32> to vector<8x88xf32>
    %55 = arith.addf %53, %54 : vector<8x88xf32>
    %56 = arith.negf %55 : vector<8x88xf32>
    %57 = math.exp %56 : vector<8x88xf32>
    %cst_37 = arith.constant 1.000000e+00 : f32
    %58 = vector.broadcast %cst_37 : f32 to vector<8x88xf32>
    %59 = arith.addf %58, %57 : vector<8x88xf32>
    %60 = arith.divf %58, %59 : vector<8x88xf32>
    %61 = tpu.concatenate %17, %52, %60 in 1 : vector<8x32xf32>, vector<8x8xf32>, vector<8x88xf32> -> vector<8x128xf32>
    %c0_38 = arith.constant 0 : index
    %c0_39 = arith.constant 0 : index
    %62 = vector.load %arg15[%c0_38, %c0_39] : memref<8x128xf32, #tpu.memory_space<vmem>>, vector<8x128xf32>
    tpu.vector_store %arg15[%c0_38, %c0_39], %61 {strides = array<i32>} : memref<8x128xf32, #tpu.memory_space<vmem>>, vector<8x128xf32>,
    return
  }
  func.func @transform_0(%arg0: i32) -> (i32, i32) {
    %c0_i32 = arith.constant 0 : i32
    %c0_i32_0 = arith.constant 0 : i32
    return %arg0, %c0_i32 : i32, i32
  }
  func.func @transform_1(%arg0: i32) -> (i32, i32) {
    %c0_i32 = arith.constant 0 : i32
    %c0_i32_0 = arith.constant 0 : i32
    return %arg0, %c0_i32 : i32, i32
  }
  func.func @transform_2(%arg0: i32) -> (i32, i32) {
    %c0_i32 = arith.constant 0 : i32
    %c0_i32_0 = arith.constant 0 : i32
    %c0_i32_1 = arith.constant 0 : i32
    return %c0_i32, %c0_i32_0 : i32, i32
  }
  func.func @transform_3(%arg0: i32) -> (i32, i32) {
    %c0_i32 = arith.constant 0 : i32
    %c0_i32_0 = arith.constant 0 : i32
    %c0_i32_1 = arith.constant 0 : i32
    return %c0_i32, %c0_i32_0 : i32, i32
  }
  func.func @transform_4(%arg0: i32) -> (i32, i32) {
    %c0_i32 = arith.constant 0 : i32
    %c0_i32_0 = arith.constant 0 : i32
    %c0_i32_1 = arith.constant 0 : i32
    return %c0_i32, %c0_i32_0 : i32, i32
  }
  func.func @transform_5(%arg0: i32) -> (i32, i32) {
    %c0_i32 = arith.constant 0 : i32
    %c0_i32_0 = arith.constant 0 : i32
    %c0_i32_1 = arith.constant 0 : i32
    return %c0_i32, %c0_i32_0 : i32, i32
  }
  func.func @transform_6(%arg0: i32) -> (i32, i32) {
    %c0_i32 = arith.constant 0 : i32
    %c0_i32_0 = arith.constant 0 : i32
    %c0_i32_1 = arith.constant 0 : i32
    return %c0_i32, %c0_i32_0 : i32, i32
  }
  func.func @transform_7(%arg0: i32) -> (i32, i32) {
    %c0_i32 = arith.constant 0 : i32
    %c0_i32_0 = arith.constant 0 : i32
    %c0_i32_1 = arith.constant 0 : i32
    return %c0_i32, %c0_i32_0 : i32, i32
  }
  func.func @transform_8(%arg0: i32) -> (i32, i32) {
    %c0_i32 = arith.constant 0 : i32
    %c0_i32_0 = arith.constant 0 : i32
    %c0_i32_1 = arith.constant 0 : i32
    return %c0_i32, %c0_i32_0 : i32, i32
  }
  func.func @transform_9(%arg0: i32) -> (i32, i32) {
    %c0_i32 = arith.constant 0 : i32
    %c0_i32_0 = arith.constant 0 : i32
    %c0_i32_1 = arith.constant 0 : i32
    return %c0_i32, %c0_i32_0 : i32, i32
  }
  func.func @transform_10(%arg0: i32) -> (i32, i32) {
    %c0_i32 = arith.constant 0 : i32
    %c0_i32_0 = arith.constant 0 : i32
    %c0_i32_1 = arith.constant 0 : i32
    return %c0_i32, %c0_i32_0 : i32, i32
  }
  func.func @transform_11(%arg0: i32) -> (i32, i32) {
    %c0_i32 = arith.constant 0 : i32
    %c0_i32_0 = arith.constant 0 : i32
    %c0_i32_1 = arith.constant 0 : i32
    return %c0_i32, %c0_i32_0 : i32, i32
  }
  func.func @transform_12(%arg0: i32) -> (i32, i32) {
    %c0_i32 = arith.constant 0 : i32
    %c0_i32_0 = arith.constant 0 : i32
    %c0_i32_1 = arith.constant 0 : i32
    return %c0_i32, %c0_i32_0 : i32, i32
  }
  func.func @transform_13(%arg0: i32) -> (i32, i32) {
    %c0_i32 = arith.constant 0 : i32
    %c0_i32_0 = arith.constant 0 : i32
    %c0_i32_1 = arith.constant 0 : i32
    return %c0_i32, %c0_i32_0 : i32, i32
  }
  func.func @transform_14(%arg0: i32) -> (i32, i32) {
    %c0_i32 = arith.constant 0 : i32
    %c0_i32_0 = arith.constant 0 : i32
    return %arg0, %c0_i32 : i32, i32
  }
}

</mosaic_0001>

<bundles_post_ra>
// kernel: tpu_custom_call.1
= control target key start
LH: loop header
LB: loop body
LE: loop exit
PB: predicated region body
PF: predicated region fallthrough
CT: control target
= control target key end

     0   :  { %v1044_v2 = vmov 0   ;;  %vm181_vm0 = vcmask 523264   ;;  %s1318_s0 = inlined_call_operand.vmem [shape: bf16[8,64], index: 0, kind: input, shape index: {}]   ;;  %s1319_s1 = inlined_call_operand.vmem [shape: f32[8,16], index: 1, kind: input, shape index: {}]   ;;  %s1320_s2 = inlined_call_operand.vmem [shape: bf16[64,256], index: 2, kind: input, shape index: {}]   ;;  %s1321_s3 = inlined_call_operand.vmem [shape: f32[1,256], index: 3, kind: input, shape index: {}]   ;;  %s1322_s4 = inlined_call_operand.vmem [shape: bf16[256,32], index: 4, kind: input, shape index: {}]   ;;  %s1323_s5 = inlined_call_operand.vmem [shape: f32[1,32], index: 5, kind: input, shape index: {}]   ;;  %s1324_s6 = inlined_call_operand.vmem [shape: bf16[16,288], index: 6, kind: input, shape index: {}]   ;;  %s1325_s7 = inlined_call_operand.vmem [shape: f32[1,288], index: 7, kind: input, shape index: {}]   ;;  %s1326_s8 = inlined_call_operand.vmem [shape: bf16[32,32], index: 8, kind: input, shape index: {}]   ;;  %s1327_s9 = inlined_call_operand.vmem [shape: f32[1,32], index: 9, kind: input, shape index: {}]   ;;  %s1328_s10 = inlined_call_operand.vmem [shape: bf16[32,8], index: 10, kind: input, shape index: {}]   ;;  %s1329_s11 = inlined_call_operand.vmem [shape: f32[1,8], index: 11, kind: input, shape index: {}]   ;;  %s1330_s12 = inlined_call_operand.vmem [shape: bf16[256,88], index: 12, kind: input, shape index: {}]   ;;  %s1331_s13 = inlined_call_operand.vmem [shape: f32[1,88], index: 13, kind: input, shape index: {}]   ;;  %s1332_s14 = inlined_call_operand.hbm [shape: f32[8,128], index: 14, kind: output, shape index: {}]  }
   0x1   :  { %v960_v0 = vld [vmem:[%s1320_s2 + $0x34] ss:$8 sps:$4 sm:$0xff]   ;;  %v962_v1 = vld [vmem:[%s1320_s2 + $0x30] ss:$8 sps:$4 sm:$0xff]   ;;  %217 = vmatprep.mubr.bf16.mxu1 %v1044_v2  ;;  %451 = vmatprep.mubr.bf16.mxu0 %v1044_v2  ;;  %v963_v3 = vld [vmem:[%s1320_s2 + $0x24] ss:$8 sps:$4 sm:$0xff]  }
   0x2   :  { %193 = vmatprep.subr.bf16.mxu1 %v960_v0  ;;  %v965_v4 = vld [vmem:[%s1320_s2 + $0x20] ss:$8 sps:$4 sm:$0xff]   ;;  %v966_v5 = vld [vmem:[%s1320_s2 + $0x14] ss:$8 sps:$4 sm:$0xff]   ;;  %v968_v6 = vld [vmem:[%s1320_s2 + $0x10] ss:$8 sps:$4 sm:$0xff]  }
   0x3   :  { %194 = vmatpush1.bf16.msra.mxu1 %v962_v1  ;;  %v969_v7 = vld [vmem:[%s1320_s2 + $0x4] ss:$8 sps:$4 sm:$0xff]   ;;  %v971_v8 = vld [vmem:[%s1320_s2] ss:$8 sps:$4 sm:$0xff]   ;;  %v972_v9 = vld [vmem:[%s1322_s4 + $0x78] sm:$0xff]  }
   0x4   :  { %195 = vmatprep.subr.bf16.mxu1 %v963_v3  ;;  %v129_v10 = vld [vmem:[%s1318_s0] sm:$0xf]  ;;  %v973_v11 = vld [vmem:[%s1322_s4 + $0x38] sm:$0xff]   ;;  %v974_v12 = vld [vmem:[%s1322_s4 + $0x70] sm:$0xff]  }
   0x5   :  { %v975_v13 = vld [vmem:[%s1322_s4 + $0x30] sm:$0xff]   ;;  %v976_v14 = vld [vmem:[%s1322_s4 + $0x68] sm:$0xff]   ;;  %v978_v16 = vld [vmem:[%s1322_s4 + $0x60] sm:$0xff]  }
   0x6   :  { %v977_v15 = vld [vmem:[%s1322_s4 + $0x28] sm:$0xff]   ;;  %v979_v17 = vld [vmem:[%s1322_s4 + $0x20] sm:$0xff]   ;;  %v980_v18 = vld [vmem:[%s1322_s4 + $0x58] sm:$0xff]  }
   0x7   :  { %196 = vmatpush1.bf16.msra.mxu1 %v965_v4  ;;  %v981_v19 = vld [vmem:[%s1322_s4 + $0x18] sm:$0xff]   ;;  %v982_v20 = vld [vmem:[%s1322_s4 + $0x50] sm:$0xff]  }
   0x8   :  { %197 = vmatprep.subr.bf16.mxu1 %v966_v5  ;;  %v983_v21 = vld [vmem:[%s1322_s4 + $0x10] sm:$0xff]  }
   0xb   :  { %198 = vmatpush1.bf16.msra.mxu1 %v968_v6 }
   0xc   :  { %199 = vmatprep.subr.bf16.mxu1 %v969_v7 }
   0xf   :  { %200 = vmatpush1.bf16.msra.mxu1 %v971_v8 }
  0x10   :  { %879 = vmatprep.subr.bf16.mxu1 %v972_v9 }
  0x12   :  { %829 = vmatmul.mubr.msk.bf16.vlgmr.msra.gmra.mxu1 %vm181_vm0, %v129_v10 }
  0x13   :  { %880 = vmatpush3.bf16.msra.mxu1 %v973_v11 }
  0x14   :  { %881 = vmatprep.subr.bf16.mxu1 %v974_v12 }
  0x17   :  { %882 = vmatpush3.bf16.msra.mxu1 %v975_v13 }
  0x18   :  { %883 = vmatprep.subr.bf16.mxu1 %v976_v14 }
  0x1b   :  { %884 = vmatpush3.bf16.msra.mxu1 %v977_v15 }
  0x1c   :  { %885 = vmatprep.subr.bf16.mxu1 %v978_v16 }
  0x1f   :  { %886 = vmatpush3.bf16.msra.mxu1 %v979_v17 }
  0x20   :  { %887 = vmatprep.subr.bf16.mxu1 %v980_v18 }
  0x23   :  { %888 = vmatpush3.bf16.msra.mxu1 %v981_v19 }
  0x24   :  { %19 = vsyncpa [#allocation3], 0  ;;  %889 = vmatprep.subr.bf16.mxu1 %v982_v20  ;;  %v984_v22 = vld [vmem:[%s1322_s4 + $0x48] sm:$0xff]   ;;  %v986_v24 = vld [vmem:[%s1322_s4 + $0x40] sm:$0xff]   ;;  %v131_v26 = vlaneseq  ;;  %v1045_v54 = vmov 0.0   ;;  %vm1046_vm1 = vmmov 0  }
  0x25   :  { %v985_v23 = vld [vmem:[%s1322_s4 + $0x8] sm:$0xff]   ;;  %v987_v25 = vld [vmem:[%s1322_s4] sm:$0xff]   ;;  %vm415_vm2 = vcmask 130048   ;;  %v994_v0 = vld [vmem:[%s1330_s12 + $0x78] sm:$0xff]   ;;  %vm529_vm3 = vcmask 261120   ;;  %s1050_s17 = smov [#allocation2]  }
  0x26   :  { %v1201_v27 = vshrl.u32 %v131_v26, 7  ;;  %v57_v29 = vld [vmem:[%s1321_s3] sm:$0x3]  ;;  %v988_v52 = vld [vmem:[%s1324_s6 + $0x4] ss:$12 sps:$4 sm:$0xff]   ;;  %v992_v62 = vld [vmem:[%s1326_s8 + $0x8] sm:$0xff]  }
  0x27   :  { %890 = vmatpush3.bf16.msra.mxu1 %v983_v21  ;;  %v830_v44 = vld [vmem:[%s1323_s5] ss:$0 sm:$0xff]  ;;  %433 = vmatprep.subr.bf16.mxu0 %v988_v52  ;;  %s1047_s5 = smov 112   ;;  %v991_v60 = vld [vmem:[%s1324_s6 + $0x8] ss:$12 sps:$4 sm:$0xff]   ;;  %v995_v17 = vld [vmem:[%s1330_s12 + $0x38] sm:$0xff]  }
  0x28   :  { %891 = vmatprep.subr.bf16.mxu1 %v984_v22  ;;  %v133_v28 = vsub.s32 0, %v1201_v27  ;;  %v137_v30 = vsub.s32 1, %v1201_v27  ;;  %v990_v53 = vld [vmem:[%s1324_s6] ss:$12 sps:$4 sm:$0xff]   ;;  %v394_v4 = vsub.s32 2, %v1201_v27  ;;  %v996_v19 = vld [vmem:[%s1330_s12 + $0x70] sm:$0xff]  }
  0x29   :  { %434 = vmatpush1.bf16.msra.mxu0 %v990_v53  ;;  %v372_v56 = vld [vmem:[%s1319_s1] sm:$0xff]  ;;  %v1010_v1 = vld [vmem:[%s1328_s10 + $0x8] sm:$0xff]   ;;  %v997_v22 = vld [vmem:[%s1330_s12 + $0x30] sm:$0xff]   ;;  %s813_s18 = sshll.u32 %s1050_s17, 4  ;;  %vm804_vm4 = vcmask 326656   ;;  %s814_s18 = int_to_ptr.vmem [resolvable:$true] %s813_s18 }
  0x2a   :  { %v134_v31 = vrot.slane %v57_v29, %v133_v28  ;;  %v138_v32 = vrot.slane %v57_v29, %v137_v30  ;;  %931 = vmatprep.subr.bf16.mxu0 %v1045_v54  ;;  %v993_v63 = vld [vmem:[%s1326_s8] sm:$0xff]   ;;  %v1002_v29 = vld [vmem:[%s1330_s12 + $0x58] sm:$0xff]   ;;  %p1027_p1 = scmp.lt.s32.totalorder %s814_s18, %s814_s18 }
  0x2b   :  { %892 = vmatpush3.bf16.msra.mxu1 %v985_v23  ;;  %v95_v3 = vld [vmem:[%s1325_s7] sm:$0x7]  ;;  %v998_v23 = vld [vmem:[%s1330_s12 + $0x68] sm:$0xff]  }
  0x2c   :  { %893 = vmatprep.subr.bf16.mxu1 %v986_v24  ;;  %v391_v5 = vrot.slane %v95_v3, %v137_v30  ;;  %v395_v8 = vrot.slane %v95_v3, %v394_v4  ;;  %v999_v24 = vld [vmem:[%s1330_s12 + $0x28] sm:$0xff]   ;;  %v1001_v26 = vld [vmem:[%s1330_s12 + $0x20] sm:$0xff]   ;;  %v1003_v30 = vld [vmem:[%s1330_s12 + $0x18] sm:$0xff]  }
  0x2d   :  { %v1009_v27 = vld [vmem:[%s1330_s12] sm:$0xff]  }
  0x2f   :  { %894 = vmatpush3.bf16.msra.mxu1 %v987_v25  ;;  %v1000_v25 = vld [vmem:[%s1330_s12 + $0x60] sm:$0xff]  }
  0x30   :  { %945 = vmatprep.subr.bf16.mxu1 %v1045_v54 }
  0xd2   :  { %v219_v33 = vpop.f32.mrf.mxu1 }
  0xd3   :  { %v220_v34 = vadd.f32 %v219_v33, %v134_v31  ;;  %v1004_v31 = vld [vmem:[%s1330_s12 + $0x50] sm:$0xff]   ;;  %v387_v33 = vrot.slane %v95_v3, %v133_v28 }
  0xd4   :  { %v221_v35 = vpop.f32.mrf.mxu1 }
  0xd5   :  { %v222_v36 = vadd.f32 %v221_v35, %v138_v32  ;;  %v226_v37 = vmax.f32 %v220_v34, 0.0  ;;  %v1005_v32 = vld [vmem:[%s1330_s12 + $0x10] sm:$0xff]   ;;  %v1006_v34 = vld [vmem:[%s1330_s12 + $0x48] sm:$0xff]  }
  0xd6   :  { %v223_v38 = vpop.f32.mrf.mxu1  ;;  %v1007_v35 = vld [vmem:[%s1330_s12 + $0x8] sm:$0xff]  }
  0xd7   :  { %v227_v39 = vmax.f32 %v222_v36, 0.0  ;;  %v228_v42 = vpack.c.bf16 %v226_v37, %v226_v37  ;;  %v1008_v37 = vld [vmem:[%s1330_s12 + $0x40] sm:$0xff]  }
  0xd8   :  { %v224_v40 = vpop.f32.mrf.mxu1 }
  0xd9   :  { %v229_v41 = vpack.c.bf16 %v227_v39, %v227_v39  ;;  %v1011_v39 = vld [vmem:[%s1328_s10] sm:$0xff]  }
  0xda   :  { %v852_v40 = vld [vmem:[%s1327_s9] ss:$0 sm:$0xff]  ;;  %s1048_s9 = smov 40  }
  0xdb   :  { %364 = vmatprep.mubr.bf16.mxu1 %v229_v41 }
  0xdc   :  { %365 = vmatmul.mubr.bf16.vlgmr.msra.gmra.mxu1 %v228_v42 }
  0xdd   :  { %949 = vmatprep.mubr.msk.bf16.mxu1 %vm1046_vm1, %v1045_v54  ;;  %946 = vmatpush3.bf16.msra.mxu1 %v1010_v1 }
  0xde   :  { %947 = vmatprep.subr.bf16.mxu1 %v1045_v54 }
  0xe1   :  { %948 = vmatpush3.bf16.msra.mxu1 %v1011_v39 }
 0x19c   :  { %v895_v43 = vpop.f32.mrf.mxu1 }
 0x19e   :  { %v896_v45 = vpop.f32.mrf.mxu1 }
 0x19f   :  { %v897_v46 = vadd.f32 %v896_v45, %v895_v43 }
 0x1a0   :  { %v898_v47 = vpop.f32.mrf.mxu1 }
 0x1a1   :  { %v1215_v48 = vadd.f32 %v897_v46, %v830_v44 }
 0x1a2   :  { %v899_v49 = vpop.f32.mrf.mxu1 }
 0x1a3   :  { %v373_v50 = vmul.f32 0.5, %v1215_v48 }
 0x1a5   :  { %v374_v51 = vmul.f32 1.442695, %v373_v50  ;;  %v861_v50 = vld [vmem:[%s1331_s13] ss:$0 sm:$0xff]  ;;  %s1049_s13 = smov 32  }
 0x1a7   :  { %1012 = vpow2.f32 %v374_v51 }
 0x1b4   :  { %v1013_v55 = vpop.eup %1012 }
 0x1b5   :  { %377 = vrot.lane.b32.xlu0 %v1013_v55, %s1047_s5 }
 0x227   :  { %v378_v57 = vpop.permute.xlu0 %377 }
 0x228   :  { %v380_v58 = vmul.f32 %v378_v57, %v372_v56 }
 0x22a   :  { %v381_v59 = vadd.f32 %v380_v58, %v1215_v48 }
 0x22c   :  { %v382_v61 = vpack.c.bf16 %v381_v59, %v381_v59 }
 0x22e   :  { %850 = vmatmul.mubr.msk.bf16.vlgmr.msra.gmra.mxu0 %vm415_vm2, %v382_v61 }
 0x22f   :  { %932 = vmatpush3.bf16.msra.mxu0 %v991_v60  ;;  %933 = vmatprep.mubr.msk.bf16.mxu0 %vm1046_vm1, %v1045_v54  ;;  %v856_v60 = vld [vmem:[%s1329_s11] ss:$0 sm:$0xff]  ;;  %s1022_s11 = scalar_lea.vmem %s814_s18, 128 }
 0x230   :  { %937 = vmatprep.subr.bf16.mxu0 %v1045_v54  ;;  %p1023_p0 = scmp.ne.s32.totalorder %s814_s18, %s1022_s11  ;;  %p1028_p2 = scmp.lt.s32.totalorder %s1022_s11, %s1022_s11 }
 0x232   :  { %p1029_p3 = por %p1028_p2, %p1027_p1 }
 0x234   :  { %p1030_p4 = pnand %p1029_p3, %p1023_p0 }
 0x236   :  { %934 = vmatmul.mubr.msk.bf16.vlgmr.msra.gmra.mxu0 %vm415_vm2, %v382_v61 }
 0x237   :  { %941 = vmatprep.mubr.msk.bf16.mxu0 %vm1046_vm1, %v1045_v54  ;;  %938 = vmatpush3.bf16.msra.mxu0 %v992_v62 }
 0x238   :  { %939 = vmatprep.subr.bf16.mxu0 %v1045_v54 }
 0x23b   :  { %940 = vmatpush3.bf16.msra.mxu0 %v993_v63 }
 0x23c   :  { %909 = vmatprep.subr.bf16.mxu0 %v994_v0 }
 0x2ee   :  { %v453_v2 = vpop.f32.mrf.mxu0 }
 0x2ef   :  { %v454_v36 = vadd.f32 %v453_v2, %v387_v33 }
 0x2f0   :  { %v455_v6 = vpop.f32.mrf.mxu0 }
 0x2f1   :  { %v456_v9 = vadd.f32 %v455_v6, %v391_v5  ;;  %v500_v28 = vmax.f32 %v454_v36, 0.0 }
 0x2f2   :  { %v457_v7 = vpop.f32.mrf.mxu0 }
 0x2f3   :  { %v501_v13 = vmax.f32 %v456_v9, 0.0  ;;  %v503_v38 = vpack.c.bf16 %v500_v28, %v500_v28 }
 0x2f4   :  { %v458_v10 = vpop.f32.mrf.mxu0 }
 0x2f5   :  { %v504_v20 = vpack.c.bf16 %v501_v13, %v501_v13 }
 0x2f6   :  { %v494_v11 = vpop.f32.mrf.mxu0 }
 0x2f7   :  { %v495_v12 = vadd.f32 %v494_v11, %v395_v8 }
 0x2f8   :  { %v935_v14 = vpop.f32.mrf.mxu0 }
 0x2f9   :  { %v502_v15 = vmax.f32 %v495_v12, 0.0 }
 0x2fa   :  { %v497_v16 = vpop.f32.mrf.mxu0 }
 0x2fb   :  { %v505_v18 = vpack.c.bf16 %v502_v15, %v502_v15 }
 0x2fc   :  { %v936_v21 = vpop.f32.mrf.mxu0 }
 0x2fd   :  { %942 = vmatmul.mubr.msk.bf16.vlgmr.msra.gmra.mxu0 %vm529_vm3, %v505_v18 }
 0x2fe   :  { %910 = vmatpush3.bf16.msra.mxu0 %v995_v17  ;;  %781 = vmatprep.mubr.bf16.mxu0 %v504_v20 }
 0x2ff   :  { %911 = vmatprep.subr.bf16.mxu0 %v996_v19 }
 0x302   :  { %912 = vmatpush3.bf16.msra.mxu0 %v997_v22 }
 0x303   :  { %913 = vmatprep.subr.bf16.mxu0 %v998_v23 }
 0x306   :  { %914 = vmatpush3.bf16.msra.mxu0 %v999_v24 }
 0x307   :  { %915 = vmatprep.subr.bf16.mxu0 %v1000_v25 }
 0x30a   :  { %916 = vmatpush3.bf16.msra.mxu0 %v1001_v26 }
 0x30b   :  { %917 = vmatprep.subr.bf16.mxu0 %v1002_v29 }
 0x30e   :  { %918 = vmatpush3.bf16.msra.mxu0 %v1003_v30 }
 0x30f   :  { %919 = vmatprep.subr.bf16.mxu0 %v1004_v31 }
 0x312   :  { %920 = vmatpush3.bf16.msra.mxu0 %v1005_v32 }
 0x313   :  { %921 = vmatprep.subr.bf16.mxu0 %v1006_v34 }
 0x316   :  { %922 = vmatpush3.bf16.msra.mxu0 %v1007_v35 }
 0x317   :  { %923 = vmatprep.subr.bf16.mxu0 %v1008_v37 }
 0x31a   :  { %924 = vmatpush3.bf16.msra.mxu0 %v1009_v27 }
 0x31d   :  { %782 = vmatmul.mubr.bf16.vlgmr.msra.gmra.mxu0 %v503_v38 }
 0x3bd   :  { %v567_v41 = vpop.f32.mrf.mxu0 }
 0x3be   :  { %v568_v42 = vadd.f32 %v852_v40, %v567_v41 }
 0x3bf   :  { %v943_v43 = vpop.f32.mrf.mxu0 }
 0x3c0   :  { %v573_v44 = vmax.f32 %v568_v42, 0.0 }
 0x3c1   :  { %v570_v45 = vpop.f32.mrf.mxu0 }
 0x3c2   :  { %v574_v46 = vpack.c.bf16 %v573_v44, %v573_v44 }
 0x3c3   :  { %v944_v47 = vpop.f32.mrf.mxu0 }
 0x3c4   :  { %950 = vmatmul.mubr.msk.bf16.vlgmr.msra.gmra.mxu1 %vm529_vm3, %v574_v46 }
 0x3dd   :  { %v925_v49 = vpop.f32.mrf.mxu0 }
 0x3df   :  { %v926_v51 = vpop.f32.mrf.mxu0 }
 0x3e0   :  { %v927_v52 = vadd.f32 %v926_v51, %v925_v49 }
 0x3e1   :  { %v928_v53 = vpop.f32.mrf.mxu0 }
 0x3e2   :  { %v784_v54 = vadd.f32 %v927_v52, %v861_v50 }
 0x3e3   :  { %v929_v55 = vpop.f32.mrf.mxu0 }
 0x3e4   :  { %v878_v56 = vmul.f32 -1.442695, %v784_v54 }
 0x3e6   :  { %1014 = vpow2.f32 %v878_v56 }
 0x3f3   :  { %v1015_v57 = vpop.eup %1014 }
 0x3f4   :  { %v792_v58 = vadd.f32 1.0, %v1015_v57 }
 0x3f6   :  { %1016 = vrcp.f32 %v792_v58 }
 0x403   :  { %v1017_v59 = vpop.eup %1016 }
 0x404   :  { %800 = vrot.lane.b32.xlu1 %v1017_v59, %s1048_s9 }
 0x476   :  { %v801_v7 = vpop.permute.xlu1 %800 }
 0x484   :  { %v635_v61 = vpop.f32.mrf.mxu1 }
 0x485   :  { %v636_v62 = vadd.f32 %v856_v60, %v635_v61 }
 0x486   :  { %v951_v63 = vpop.f32.mrf.mxu1 }
 0x487   :  { %v860_v0 = vmul.f32 -1.442695, %v636_v62 }
 0x488   :  { %v638_v1 = vpop.f32.mrf.mxu1 }
 0x489   :  { %1018 = vpow2.f32 %v860_v0 }
 0x48a   :  { %v952_v2 = vpop.f32.mrf.mxu1 }
 0x496   :  { %v1019_v3 = vpop.eup %1018 }
 0x497   :  { %v644_v4 = vadd.f32 1.0, %v1019_v3 }
 0x499   :  { %1020 = vrcp.f32 %v644_v4 }
 0x4a6   :  { %v1021_v5 = vpop.eup %1020 }
 0x4a7   :  { %796 = vrot.lane.b32.xlu0 %v1021_v5, %s1049_s13 }
 0x519   :  { %v797_v6 = vpop.permute.xlu0 %796 }
 0x51a   :  { %v803_v8 = vsel %vm529_vm3, %v1215_v48, %v797_v6 }
 0x51b   :  { %v805_v9 = vsel %vm804_vm4, %v803_v8, %v801_v7 }
 0x51c   :  { %806 = vst [vmem:[#allocation2] sm:$0xff] %v805_v9 }
 0x51d   :  { %1033 = shalt.err (!%p1030_p4)
}
 0x51e   :  { %816 = dma.vmem_to_hbm [thread:$0]  %s814_s18, 128, %s1332_s14, [#allocation3]  }
 0x51f   :  { %1042 = dma.done.wait [#allocation3], 128  }
 0x520   :  { %1043 = vsyncadd [#allocation3], 4294967168 }
 0x521   :  { %820 = vsyncpa [#allocation3], 1 }

</bundles_post_ra>
